<compile_context>
chip_gen: v7x
topology: tpu7x:2x2x1
jax: 0.10.0
libtpu: 0.0.40
codegen_flags: <defaults>
</compile_context>

<pallas_src>
import numpy as np
import jax
import jax.numpy as jnp
from jax.experimental import pallas as pl
from jax.experimental.pallas import tpu as pltpu


# --------------------------- trace-time index math --------------------------- #

def _reflect_index(p, size):
    """PyTorch ReflectionPad2d index map (no edge repeat); requires |pad| < size."""
    if p < 0:
        p = -p
    elif p >= size:
        p = 2 * size - 2 - p
    assert 0 <= p < size, "reflection padding larger than the upsampled dimension"
    return p


# ------------------------------- Pallas kernel ------------------------------- #

def _make_gather_kernel(row_src, col_src):
    """Fused 2x nearest upsample + reflection pad as static slice/concat gathers.

    row_src[i] / col_src[j] are trace-time source indices into x2's H2 / W2 for
    every output row i / column j (reflection over the upsampled grid folded in).
    """
    row_src = tuple(int(r) for r in row_src)
    col_src = tuple(int(c) for c in col_src)

    def kernel(x_ref, o_ref):
        x = x_ref[...]                                            # (Mt, H2, W2)
        # Column gather (lane axis): static width-1 slices + one concatenate.
        cols = [x[:, :, c:c + 1] for c in range(x.shape[2])]
        xc = jnp.concatenate([cols[c] for c in col_src], axis=2)  # (Mt, H2, W1)
        # Row gather (sublane axis): static height-1 slices + one concatenate.
        rows = [xc[:, r:r + 1, :] for r in range(xc.shape[1])]
        out = jnp.concatenate([rows[r] for r in row_src], axis=1)  # (Mt, H1, W1)
        o_ref[...] = out                                           # bit-exact copy

    return kernel


# --------------------------------- wrapper ----------------------------------- #

def upsample_reshape_eval(x1, x2):
    """Pallas TPU implementation of UpsampleReshape_eval.forward(x1, x2).

    x1: (N, C1, H1, W1) -- only its spatial shape is used
    x2: (N, C2, H2, W2)
    returns ReflectionPad2d(pad)(Upsample(scale_factor=2)(x2)), shape (N, C2, H1, W1).
    """
    N, C, H2, W2 = x2.shape
    H1, W1 = int(x1.shape[2]), int(x1.shape[3])
    Hu, Wu = 2 * H2, 2 * W2

    # Replicates the reference's even/odd branching exactly (int() truncation).
    height_diff = H1 - Hu
    width_diff = W1 - Wu
    pad_top = int(height_diff / 2)
    pad_left = int(width_diff / 2)
    # pad_bottom / pad_right are implied by the output size H1/W1.

    # Static source pixel for every output pixel: reflect over the upsampled
    # grid, then nearest-downmap (//2) into x2.
    row_src = [_reflect_index(i - pad_top, Hu) // 2 for i in range(H1)]
    col_src = [_reflect_index(j - pad_left, Wu) // 2 for j in range(W1)]

    M = N * C
    x2m = x2.reshape(M, H2, W2)          # contiguous reshape: no copy, native dtype

    itemsize = x2.dtype.itemsize
    bytes_per_row = (H2 * W2 + H1 * W1) * itemsize
    # ~8 MiB per grid step (double-buffered in + out) fits the scoped-VMEM
    # default on v5e/v6e and v7x (64 MiB physical).
    budget = 8 * 1024 * 1024
    m_tile = max(1, min(M, budget // (2 * max(bytes_per_row, 1))))
    m_tile = min(m_tile, 512)
    if m_tile >= 8:
        m_tile = (m_tile // 8) * 8       # keep a clean multiple of 8 when possible

    grid = (pl.cdiv(M, m_tile),)

    out_m = pl.pallas_call(
        _make_gather_kernel(row_src, col_src),
        out_shape=jax.ShapeDtypeStruct((M, H1, W1), x2.dtype),
        grid=grid,
        in_specs=[pl.BlockSpec((m_tile, H2, W2), lambda m: (m, 0, 0))],
        out_specs=pl.BlockSpec((m_tile, H1, W1), lambda m: (m, 0, 0)),
        compiler_params=pltpu.CompilerParams(
            dimension_semantics=("parallel",)),
        cost_estimate=pl.CostEstimate(
            flops=0,
            transcendentals=0,
            bytes_accessed=(M * H2 * W2 + M * H1 * W1) * itemsize),
    )(x2m)

    return out_m.reshape(N, C, H1, W1)


# --------------------------- pure-JAX reference ------------------------------ #

def upsample_reshape_eval_ref(x1, x2):
    x2u = jnp.repeat(jnp.repeat(x2, 2, axis=2), 2, axis=3)
    H1, W1 = int(x1.shape[2]), int(x1.shape[3])
    hd = H1 - x2u.shape[2]
    wd = W1 - x2u.shape[3]
    pt = int(hd / 2); pb = hd - pt
    pleft = int(wd / 2); pright = wd - pleft
    return jnp.pad(x2u, ((0, 0), (0, 0), (pt, pb), (pleft, pright)),
                   mode="reflect")


# ----------------------------------- main ------------------------------------ #

if __name__ == "__main__":
    key = jax.random.PRNGKey(0)
    k1, k2, k3, k4 = jax.random.split(key, 4)

    fwd = jax.jit(upsample_reshape_eval)

    # Main case: even H/W difference.
    x1 = jax.random.normal(k1, (2, 4, 16, 16), jnp.float32)
    x2 = jax.random.normal(k2, (2, 4, 7, 7), jnp.float32)
    out = jax.block_until_ready(fwd(x1, x2))
    ref = np.asarray(upsample_reshape_eval_ref(x1, x2))
    assert out.shape == (2, 4, 16, 16), out.shape
    assert out.dtype == jnp.float32
    np.testing.assert_array_equal(np.asarray(out), ref)   # bit-exact data movement

    # Odd-difference case exercises the other branch of the reference pad math.
    x1b = jax.random.normal(k3, (2, 4, 17, 15), jnp.float32)
    x2b = jax.random.normal(k4, (2, 4, 7, 6), jnp.float32)
    outb = jax.block_until_ready(fwd(x1b, x2b))
    refb = np.asarray(upsample_reshape_eval_ref(x1b, x2b))
    assert outb.shape == (2, 4, 17, 15), outb.shape
    np.testing.assert_array_equal(np.asarray(outb), refb)

    print("KERNEL_OK")
</pallas_src>

<mosaic_0001>
module attributes {stable_mosaic.version = 11 : i64} {
  func.func @kernel(%arg0: i32, %arg1: memref<8x7x7xf32, #tpu.memory_space<vmem>>, %arg2: memref<8x16x16xf32, #tpu.memory_space<vmem>>) attributes {dimension_semantics = [#tpu.dimension_semantics<parallel>], iteration_bounds = array<i64: 1>, scalar_prefetch = 0 : i64, scratch_operands = 0 : i64, tpu.core_type = #tpu.core_type<tc>, window_params = [{transform_indices = @transform_0, window_bounds = array<i64: 8, 7, 7>}, {transform_indices = @transform_1, window_bounds = array<i64: 8, 16, 16>}]} {
    %c0 = arith.constant 0 : index
    %c0_0 = arith.constant 0 : index
    %c0_1 = arith.constant 0 : index
    %0 = vector.load %arg1[%c0, %c0_0, %c0_1] : memref<8x7x7xf32, #tpu.memory_space<vmem>>, vector<8x7x7xf32>
    %1 = vector.extract_strided_slice %0 {offsets = [0, 0, 0], sizes = [8, 7, 1], strides = [1, 1, 1]} : vector<8x7x7xf32> to vector<8x7x1xf32>
    %2 = vector.extract_strided_slice %0 {offsets = [0, 0, 1], sizes = [8, 7, 1], strides = [1, 1, 1]} : vector<8x7x7xf32> to vector<8x7x1xf32>
    %3 = vector.extract_strided_slice %0 {offsets = [0, 0, 2], sizes = [8, 7, 1], strides = [1, 1, 1]} : vector<8x7x7xf32> to vector<8x7x1xf32>
    %4 = vector.extract_strided_slice %0 {offsets = [0, 0, 3], sizes = [8, 7, 1], strides = [1, 1, 1]} : vector<8x7x7xf32> to vector<8x7x1xf32>
    %5 = vector.extract_strided_slice %0 {offsets = [0, 0, 4], sizes = [8, 7, 1], strides = [1, 1, 1]} : vector<8x7x7xf32> to vector<8x7x1xf32>
    %6 = vector.extract_strided_slice %0 {offsets = [0, 0, 5], sizes = [8, 7, 1], strides = [1, 1, 1]} : vector<8x7x7xf32> to vector<8x7x1xf32>
    %7 = vector.extract_strided_slice %0 {offsets = [0, 0, 6], sizes = [8, 7, 1], strides = [1, 1, 1]} : vector<8x7x7xf32> to vector<8x7x1xf32>
    %8 = tpu.concatenate %1, %1, %1, %2, %2, %3, %3, %4, %4, %5, %5, %6, %6, %7, %7, %7 in 2 : vector<8x7x1xf32>, vector<8x7x1xf32>, vector<8x7x1xf32>, vector<8x7x1xf32>, vector<8x7x1xf32>, vector<8x7x1xf32>, vector<8x7x1xf32>, vector<8x7x1xf32>, vector<8x7x1xf32>, vector<8x7x1xf32>, vector<8x7x1xf32>, vector<8x7x1xf32>, vector<8x7x1xf32>, vector<8x7x1xf32>, vector<8x7x1xf32>, vector<8x7x1xf32> -> vector<8x7x16xf32>
    %9 = vector.extract_strided_slice %8 {offsets = [0, 0, 0], sizes = [8, 1, 16], strides = [1, 1, 1]} : vector<8x7x16xf32> to vector<8x1x16xf32>
    %10 = vector.extract_strided_slice %8 {offsets = [0, 1, 0], sizes = [8, 1, 16], strides = [1, 1, 1]} : vector<8x7x16xf32> to vector<8x1x16xf32>
    %11 = vector.extract_strided_slice %8 {offsets = [0, 2, 0], sizes = [8, 1, 16], strides = [1, 1, 1]} : vector<8x7x16xf32> to vector<8x1x16xf32>
    %12 = vector.extract_strided_slice %8 {offsets = [0, 3, 0], sizes = [8, 1, 16], strides = [1, 1, 1]} : vector<8x7x16xf32> to vector<8x1x16xf32>
    %13 = vector.extract_strided_slice %8 {offsets = [0, 4, 0], sizes = [8, 1, 16], strides = [1, 1, 1]} : vector<8x7x16xf32> to vector<8x1x16xf32>
    %14 = vector.extract_strided_slice %8 {offsets = [0, 5, 0], sizes = [8, 1, 16], strides = [1, 1, 1]} : vector<8x7x16xf32> to vector<8x1x16xf32>
    %15 = vector.extract_strided_slice %8 {offsets = [0, 6, 0], sizes = [8, 1, 16], strides = [1, 1, 1]} : vector<8x7x16xf32> to vector<8x1x16xf32>
    %16 = tpu.concatenate %9, %9, %9, %10, %10, %11, %11, %12, %12, %13, %13, %14, %14, %15, %15, %15 in 1 : vector<8x1x16xf32>, vector<8x1x16xf32>, vector<8x1x16xf32>, vector<8x1x16xf32>, vector<8x1x16xf32>, vector<8x1x16xf32>, vector<8x1x16xf32>, vector<8x1x16xf32>, vector<8x1x16xf32>, vector<8x1x16xf32>, vector<8x1x16xf32>, vector<8x1x16xf32>, vector<8x1x16xf32>, vector<8x1x16xf32>, vector<8x1x16xf32>, vector<8x1x16xf32> -> vector<8x16x16xf32>
    %c0_2 = arith.constant 0 : index
    %c0_3 = arith.constant 0 : index
    %c0_4 = arith.constant 0 : index
    %17 = vector.load %arg2[%c0_2, %c0_3, %c0_4] : memref<8x16x16xf32, #tpu.memory_space<vmem>>, vector<8x16x16xf32>
    tpu.vector_store %arg2[%c0_2, %c0_3, %c0_4], %16 {strides = array<i32>} : memref<8x16x16xf32, #tpu.memory_space<vmem>>, vector<8x16x16xf32>,
    return
  }
  func.func @transform_0(%arg0: i32) -> (i32, i32, i32) {
    %c0_i32 = arith.constant 0 : i32
    %c0_i32_0 = arith.constant 0 : i32
    %c0_i32_1 = arith.constant 0 : i32
    return %arg0, %c0_i32, %c0_i32_0 : i32, i32, i32
  }
  func.func @transform_1(%arg0: i32) -> (i32, i32, i32) {
    %c0_i32 = arith.constant 0 : i32
    %c0_i32_0 = arith.constant 0 : i32
    %c0_i32_1 = arith.constant 0 : i32
    return %arg0, %c0_i32, %c0_i32_0 : i32, i32, i32
  }
}

</mosaic_0001>

<bundles_post_ra>
// kernel: upsample_reshape_eval.1
= control target key start
LH: loop header
LB: loop body
LE: loop exit
PB: predicated region body
PF: predicated region fallthrough
CT: control target
= control target key end

     0   :  { %s675_s10 = smov 1   ;;  %s1110_s0 = inlined_call_operand.vmem [shape: f32[8,7,7], index: 0, kind: input, shape index: {}]   ;;  %s1111_s1 = inlined_call_operand.hbm [shape: f32[8,16,16], index: 1, kind: output, shape index: {}]  }
   0x1   :  { %v699_v0 = vld [vmem:[%s1110_s0 + $0x10] sm:$0x7f]  ;;  %v704_v1 = vld [vmem:[%s1110_s0] sm:$0x7f]  ;;  %v711_v2 = vld [vmem:[%s1110_s0 + $0x18] sm:$0x7f] }
   0x2   :  { %29 = vrot.lane.b32.xlu1 %v699_v0, %s675_s10  ;;  %25 = vrot.lane.b32.xlu0 %v704_v1, %s675_s10  ;;  %v716_v3 = vld [vmem:[%s1110_s0 + $0x8] sm:$0x7f] }
   0x3   :  { %6 = vsyncpa [#allocation3], 0  ;;  %v723_v4 = vld [vmem:[%s1110_s0 + $0x28] sm:$0x7f]  ;;  %v728_v5 = vld [vmem:[%s1110_s0 + $0x20] sm:$0x7f] }
   0x4   :  { %v735_v6 = vld [vmem:[%s1110_s0 + $0x38] sm:$0x7f]  ;;  %v740_v7 = vld [vmem:[%s1110_s0 + $0x30] sm:$0x7f]  ;;  %s676_s23 = smov 2   ;;  %s677_s0 = smov 3  }
   0x5   :  { %s678_s24 = smov 4   ;;  %s679_s25 = smov 5   ;;  %vm241_vm0 = vcmask 7168   ;;  %vm250_vm1 = vcmask 15360   ;;  %vm259_vm2 = vcmask 23552   ;;  %vm268_vm3 = vcmask 31744  }
   0x6   :  { %31 = vrot.lane.b32.xlu1 %v711_v2, %s675_s10  ;;  %27 = vrot.lane.b32.xlu0 %v716_v3, %s675_s10  ;;  %s680_s26 = smov 6   ;;  %s681_s27 = smov 7   ;;  %vm277_vm4 = vcmask 39936   ;;  %vm286_vm5 = vcmask 48128   ;;  %vm295_vm6 = vcmask 56320   ;;  %vm304_vm7 = vcmask 64512  }
   0x7   :  { %s682_s28 = smov 8   ;;  %s683_s29 = smov 9   ;;  %vm313_vm8 = vcmask 72704   ;;  %vm322_vm9 = vcmask 80896   ;;  %vm331_vm10 = vcmask 89088   ;;  %vm340_vm11 = vcmask 97280  }
   0x8   :  { %vm349_vm12 = vcmask 105472   ;;  %vm358_vm13 = vcmask 113664   ;;  %vm367_vm14 = vcmask 121856   ;;  %vm496_vm15 = vcmask 1040384   ;;  %s684_s30 = smov [#allocation2]  }
   0x9   :  { %s629_s2 = sshll.u32 %s684_s30, 4  ;;  %s630_s2 = int_to_ptr.vmem [resolvable:$true] %s629_s2 }
   0xa   :  { %35 = vrot.lane.b32.xlu1 %v723_v4, %s675_s10  ;;  %33 = vrot.lane.b32.xlu0 %v728_v5, %s675_s10  ;;  %s651_s3 = scalar_lea.vmem %s630_s2, 2048  ;;  %p656_p1 = scmp.lt.s32.totalorder %s630_s2, %s630_s2 }
   0xb   :  { %p652_p0 = scmp.ne.s32.totalorder %s630_s2, %s651_s3  ;;  %p657_p2 = scmp.lt.s32.totalorder %s651_s3, %s651_s3 }
   0xd   :  { %p658_p3 = por %p657_p2, %p656_p1 }
   0xe   :  { %39 = vrot.lane.b32.xlu1 %v735_v6, %s675_s10  ;;  %37 = vrot.lane.b32.xlu0 %v740_v7, %s675_s10 }
   0xf   :  { %p659_p4 = pnand %p658_p3, %p652_p0 }
  0x12   :  { %51 = vrot.lane.b32.xlu1 %v716_v3, %s676_s23  ;;  %49 = vrot.lane.b32.xlu0 %v704_v1, %s676_s23 }
  0x16   :  { %55 = vrot.lane.b32.xlu1 %v711_v2, %s676_s23  ;;  %53 = vrot.lane.b32.xlu0 %v699_v0, %s676_s23 }
  0x1a   :  { %59 = vrot.lane.b32.xlu1 %v723_v4, %s676_s23  ;;  %57 = vrot.lane.b32.xlu0 %v728_v5, %s676_s23 }
  0x1e   :  { %63 = vrot.lane.b32.xlu1 %v735_v6, %s676_s23  ;;  %61 = vrot.lane.b32.xlu0 %v740_v7, %s676_s23 }
  0x22   :  { %75 = vrot.lane.b32.xlu1 %v716_v3, %s677_s0  ;;  %73 = vrot.lane.b32.xlu0 %v704_v1, %s677_s0 }
  0x26   :  { %79 = vrot.lane.b32.xlu1 %v711_v2, %s677_s0  ;;  %77 = vrot.lane.b32.xlu0 %v699_v0, %s677_s0 }
  0x2a   :  { %83 = vrot.lane.b32.xlu1 %v723_v4, %s677_s0  ;;  %81 = vrot.lane.b32.xlu0 %v728_v5, %s677_s0 }
  0x2e   :  { %87 = vrot.lane.b32.xlu1 %v735_v6, %s677_s0  ;;  %85 = vrot.lane.b32.xlu0 %v740_v7, %s677_s0 }
  0x32   :  { %99 = vrot.lane.b32.xlu1 %v716_v3, %s678_s24  ;;  %97 = vrot.lane.b32.xlu0 %v704_v1, %s678_s24 }
  0x36   :  { %103 = vrot.lane.b32.xlu1 %v711_v2, %s678_s24  ;;  %101 = vrot.lane.b32.xlu0 %v699_v0, %s678_s24 }
  0x3a   :  { %107 = vrot.lane.b32.xlu1 %v723_v4, %s678_s24  ;;  %105 = vrot.lane.b32.xlu0 %v728_v5, %s678_s24 }
  0x3e   :  { %111 = vrot.lane.b32.xlu1 %v735_v6, %s678_s24  ;;  %109 = vrot.lane.b32.xlu0 %v740_v7, %s678_s24 }
  0x42   :  { %123 = vrot.lane.b32.xlu1 %v716_v3, %s679_s25  ;;  %121 = vrot.lane.b32.xlu0 %v704_v1, %s679_s25 }
  0x46   :  { %127 = vrot.lane.b32.xlu1 %v711_v2, %s679_s25  ;;  %125 = vrot.lane.b32.xlu0 %v699_v0, %s679_s25 }
  0x4a   :  { %131 = vrot.lane.b32.xlu1 %v723_v4, %s679_s25  ;;  %129 = vrot.lane.b32.xlu0 %v728_v5, %s679_s25 }
  0x4e   :  { %135 = vrot.lane.b32.xlu1 %v735_v6, %s679_s25  ;;  %133 = vrot.lane.b32.xlu0 %v740_v7, %s679_s25 }
  0x52   :  { %147 = vrot.lane.b32.xlu1 %v716_v3, %s680_s26  ;;  %145 = vrot.lane.b32.xlu0 %v704_v1, %s680_s26 }
  0x56   :  { %151 = vrot.lane.b32.xlu1 %v711_v2, %s680_s26  ;;  %149 = vrot.lane.b32.xlu0 %v699_v0, %s680_s26 }
  0x5a   :  { %155 = vrot.lane.b32.xlu1 %v723_v4, %s680_s26  ;;  %153 = vrot.lane.b32.xlu0 %v728_v5, %s680_s26 }
  0x5e   :  { %159 = vrot.lane.b32.xlu1 %v735_v6, %s680_s26  ;;  %157 = vrot.lane.b32.xlu0 %v740_v7, %s680_s26 }
  0x62   :  { %171 = vrot.lane.b32.xlu1 %v716_v3, %s681_s27  ;;  %169 = vrot.lane.b32.xlu0 %v704_v1, %s681_s27 }
  0x66   :  { %175 = vrot.lane.b32.xlu1 %v711_v2, %s681_s27  ;;  %173 = vrot.lane.b32.xlu0 %v699_v0, %s681_s27 }
  0x6a   :  { %179 = vrot.lane.b32.xlu1 %v723_v4, %s681_s27  ;;  %177 = vrot.lane.b32.xlu0 %v728_v5, %s681_s27 }
  0x6e   :  { %183 = vrot.lane.b32.xlu1 %v735_v6, %s681_s27  ;;  %181 = vrot.lane.b32.xlu0 %v740_v7, %s681_s27 }
  0x72   :  { %195 = vrot.lane.b32.xlu1 %v716_v3, %s682_s28  ;;  %193 = vrot.lane.b32.xlu0 %v704_v1, %s682_s28 }
  0x74   :  { %v30_v8 = vpop.permute.xlu1 %29  ;;  %v26_v9 = vpop.permute.xlu0 %25 }
  0x75   :  { %v242_v16 = vsel %vm241_vm0, %v704_v1, %v26_v9  ;;  %v244_v24 = vsel %vm241_vm0, %v699_v0, %v30_v8 }
  0x76   :  { %199 = vrot.lane.b32.xlu1 %v711_v2, %s682_s28  ;;  %197 = vrot.lane.b32.xlu0 %v699_v0, %s682_s28 }
  0x78   :  { %v32_v10 = vpop.permute.xlu1 %31  ;;  %v28_v11 = vpop.permute.xlu0 %27 }
  0x79   :  { %v243_v17 = vsel %vm241_vm0, %v716_v3, %v28_v11  ;;  %v245_v25 = vsel %vm241_vm0, %v711_v2, %v32_v10 }
  0x7a   :  { %203 = vrot.lane.b32.xlu1 %v723_v4, %s682_s28  ;;  %201 = vrot.lane.b32.xlu0 %v728_v5, %s682_s28 }
  0x7c   :  { %v36_v12 = vpop.permute.xlu1 %35  ;;  %v34_v13 = vpop.permute.xlu0 %33 }
  0x7d   :  { %v247_v32 = vsel %vm241_vm0, %v723_v4, %v36_v12  ;;  %v246_v33 = vsel %vm241_vm0, %v728_v5, %v34_v13 }
  0x7e   :  { %207 = vrot.lane.b32.xlu1 %v735_v6, %s682_s28  ;;  %205 = vrot.lane.b32.xlu0 %v740_v7, %s682_s28 }
  0x80   :  { %v40_v14 = vpop.permute.xlu1 %39  ;;  %v38_v15 = vpop.permute.xlu0 %37 }
  0x81   :  { %v249_v40 = vsel %vm241_vm0, %v735_v6, %v40_v14  ;;  %v248_v41 = vsel %vm241_vm0, %v740_v7, %v38_v15  ;;  %vm505_vm0 = vcmask 1041408  }
  0x82   :  { %219 = vrot.lane.b32.xlu1 %v716_v3, %s683_s29  ;;  %217 = vrot.lane.b32.xlu0 %v704_v1, %s683_s29 }
  0x84   :  { %v52_v18 = vpop.permute.xlu1 %51  ;;  %v50_v19 = vpop.permute.xlu0 %49 }
  0x85   :  { %v252_v20 = vsel %vm250_vm1, %v243_v17, %v52_v18  ;;  %v251_v21 = vsel %vm250_vm1, %v242_v16, %v50_v19 }
  0x86   :  { %v261_v22 = vsel %vm259_vm2, %v252_v20, %v52_v18  ;;  %v260_v23 = vsel %vm259_vm2, %v251_v21, %v50_v19  ;;  %223 = vrot.lane.b32.xlu1 %v711_v2, %s683_s29  ;;  %221 = vrot.lane.b32.xlu0 %v699_v0, %s683_s29 }
  0x88   :  { %v56_v26 = vpop.permute.xlu1 %55  ;;  %v54_v27 = vpop.permute.xlu0 %53 }
  0x89   :  { %v254_v28 = vsel %vm250_vm1, %v245_v25, %v56_v26  ;;  %v253_v29 = vsel %vm250_vm1, %v244_v24, %v54_v27 }
  0x8a   :  { %v263_v30 = vsel %vm259_vm2, %v254_v28, %v56_v26  ;;  %v262_v31 = vsel %vm259_vm2, %v253_v29, %v54_v27  ;;  %227 = vrot.lane.b32.xlu1 %v723_v4, %s683_s29  ;;  %225 = vrot.lane.b32.xlu0 %v728_v5, %s683_s29 }
  0x8c   :  { %v60_v34 = vpop.permute.xlu1 %59  ;;  %v58_v35 = vpop.permute.xlu0 %57 }
  0x8d   :  { %v256_v36 = vsel %vm250_vm1, %v247_v32, %v60_v34  ;;  %v255_v37 = vsel %vm250_vm1, %v246_v33, %v58_v35 }
  0x8e   :  { %v265_v38 = vsel %vm259_vm2, %v256_v36, %v60_v34  ;;  %v264_v39 = vsel %vm259_vm2, %v255_v37, %v58_v35  ;;  %231 = vrot.lane.b32.xlu1 %v735_v6, %s683_s29  ;;  %229 = vrot.lane.b32.xlu0 %v740_v7, %s683_s29 }
  0x90   :  { %v64_v42 = vpop.permute.xlu1 %63  ;;  %v62_v43 = vpop.permute.xlu0 %61 }
  0x91   :  { %v258_v44 = vsel %vm250_vm1, %v249_v40, %v64_v42  ;;  %v257_v45 = vsel %vm250_vm1, %v248_v41, %v62_v43  ;;  %vm514_vm1 = vcmask 1042432  }
  0x92   :  { %v267_v46 = vsel %vm259_vm2, %v258_v44, %v64_v42  ;;  %v266_v47 = vsel %vm259_vm2, %v257_v45, %v62_v43  ;;  %vm523_vm2 = vcmask 1043456  }
  0x94   :  { %v76_v48 = vpop.permute.xlu1 %75  ;;  %v74_v49 = vpop.permute.xlu0 %73 }
  0x95   :  { %v270_v50 = vsel %vm268_vm3, %v261_v22, %v76_v48  ;;  %v269_v51 = vsel %vm268_vm3, %v260_v23, %v74_v49 }
  0x96   :  { %v279_v52 = vsel %vm277_vm4, %v270_v50, %v76_v48  ;;  %v278_v53 = vsel %vm277_vm4, %v269_v51, %v74_v49 }
  0x98   :  { %v80_v54 = vpop.permute.xlu1 %79  ;;  %v78_v55 = vpop.permute.xlu0 %77 }
  0x99   :  { %v272_v56 = vsel %vm268_vm3, %v263_v30, %v80_v54  ;;  %v271_v57 = vsel %vm268_vm3, %v262_v31, %v78_v55 }
  0x9a   :  { %v281_v58 = vsel %vm277_vm4, %v272_v56, %v80_v54  ;;  %v280_v59 = vsel %vm277_vm4, %v271_v57, %v78_v55 }
  0x9c   :  { %v84_v60 = vpop.permute.xlu1 %83  ;;  %v82_v61 = vpop.permute.xlu0 %81 }
  0x9d   :  { %v274_v62 = vsel %vm268_vm3, %v265_v38, %v84_v60  ;;  %v273_v63 = vsel %vm268_vm3, %v264_v39, %v82_v61 }
  0x9e   :  { %v283_v0 = vsel %vm277_vm4, %v274_v62, %v84_v60  ;;  %v282_v1 = vsel %vm277_vm4, %v273_v63, %v82_v61 }
  0xa0   :  { %v88_v2 = vpop.permute.xlu1 %87  ;;  %v86_v3 = vpop.permute.xlu0 %85 }
  0xa1   :  { %v276_v4 = vsel %vm268_vm3, %v267_v46, %v88_v2  ;;  %v275_v5 = vsel %vm268_vm3, %v266_v47, %v86_v3  ;;  %vm532_vm3 = vcmask 1044480  }
  0xa2   :  { %v285_v6 = vsel %vm277_vm4, %v276_v4, %v88_v2  ;;  %v284_v7 = vsel %vm277_vm4, %v275_v5, %v86_v3  ;;  %vm541_vm4 = vcmask 1045504  }
  0xa4   :  { %v100_v8 = vpop.permute.xlu1 %99  ;;  %v98_v9 = vpop.permute.xlu0 %97 }
  0xa5   :  { %v288_v10 = vsel %vm286_vm5, %v279_v52, %v100_v8  ;;  %v287_v11 = vsel %vm286_vm5, %v278_v53, %v98_v9 }
  0xa6   :  { %v875_v12 = vsel %vm295_vm6, %v288_v10, %v100_v8  ;;  %v878_v13 = vsel %vm295_vm6, %v287_v11, %v98_v9 }
  0xa8   :  { %v104_v14 = vpop.permute.xlu1 %103  ;;  %v102_v15 = vpop.permute.xlu0 %101 }
  0xa9   :  { %v290_v16 = vsel %vm286_vm5, %v281_v58, %v104_v14  ;;  %v289_v17 = vsel %vm286_vm5, %v280_v59, %v102_v15 }
  0xaa   :  { %v299_v18 = vsel %vm295_vm6, %v290_v16, %v104_v14  ;;  %v298_v19 = vsel %vm295_vm6, %v289_v17, %v102_v15 }
  0xac   :  { %v108_v20 = vpop.permute.xlu1 %107  ;;  %v106_v21 = vpop.permute.xlu0 %105 }
  0xad   :  { %v292_v22 = vsel %vm286_vm5, %v283_v0, %v108_v20  ;;  %v291_v23 = vsel %vm286_vm5, %v282_v1, %v106_v21 }
  0xae   :  { %v301_v24 = vsel %vm295_vm6, %v292_v22, %v108_v20  ;;  %v300_v25 = vsel %vm295_vm6, %v291_v23, %v106_v21 }
  0xb0   :  { %v112_v26 = vpop.permute.xlu1 %111  ;;  %v110_v27 = vpop.permute.xlu0 %109 }
  0xb1   :  { %v294_v28 = vsel %vm286_vm5, %v285_v6, %v112_v26  ;;  %v293_v29 = vsel %vm286_vm5, %v284_v7, %v110_v27  ;;  %vm550_vm5 = vcmask 1046528  }
  0xb2   :  { %v303_v30 = vsel %vm295_vm6, %v294_v28, %v112_v26  ;;  %v302_v31 = vsel %vm295_vm6, %v293_v29, %v110_v27  ;;  %vm607_vm6 = vcmask 130048  }
  0xb4   :  { %v124_v32 = vpop.permute.xlu1 %123  ;;  %v122_v33 = vpop.permute.xlu0 %121 }
  0xb5   :  { %v306_v8 = vsel %vm304_vm7, %v875_v12, %v124_v32  ;;  %v305_v9 = vsel %vm304_vm7, %v878_v13, %v122_v33 }
  0xb6   :  { %v315_v14 = vsel %vm313_vm8, %v306_v8, %v124_v32  ;;  %v314_v15 = vsel %vm313_vm8, %v305_v9, %v122_v33 }
  0xb8   :  { %v128_v34 = vpop.permute.xlu1 %127  ;;  %v126_v35 = vpop.permute.xlu0 %125 }
  0xb9   :  { %v308_v36 = vsel %vm304_vm7, %v299_v18, %v128_v34  ;;  %v307_v37 = vsel %vm304_vm7, %v298_v19, %v126_v35 }
  0xba   :  { %v317_v38 = vsel %vm313_vm8, %v308_v36, %v128_v34  ;;  %v316_v39 = vsel %vm313_vm8, %v307_v37, %v126_v35 }
  0xbc   :  { %v132_v40 = vpop.permute.xlu1 %131  ;;  %v130_v41 = vpop.permute.xlu0 %129 }
  0xbd   :  { %v310_v42 = vsel %vm304_vm7, %v301_v24, %v132_v40  ;;  %v309_v43 = vsel %vm304_vm7, %v300_v25, %v130_v41 }
  0xbe   :  { %v319_v44 = vsel %vm313_vm8, %v310_v42, %v132_v40  ;;  %v318_v45 = vsel %vm313_vm8, %v309_v43, %v130_v41 }
  0xc0   :  { %v136_v46 = vpop.permute.xlu1 %135  ;;  %v134_v47 = vpop.permute.xlu0 %133 }
  0xc1   :  { %v312_v48 = vsel %vm304_vm7, %v303_v30, %v136_v46  ;;  %v311_v49 = vsel %vm304_vm7, %v302_v31, %v134_v47 }
  0xc2   :  { %v321_v50 = vsel %vm313_vm8, %v312_v48, %v136_v46  ;;  %v320_v51 = vsel %vm313_vm8, %v311_v49, %v134_v47 }
  0xc4   :  { %v148_v52 = vpop.permute.xlu1 %147  ;;  %v146_v53 = vpop.permute.xlu0 %145 }
  0xc5   :  { %v324_v16 = vsel %vm322_vm9, %v315_v14, %v148_v52  ;;  %v323_v17 = vsel %vm322_vm9, %v314_v15, %v146_v53 }
  0xc6   :  { %v333_v23 = vsel %vm331_vm10, %v324_v16, %v148_v52  ;;  %v332_v24 = vsel %vm331_vm10, %v323_v17, %v146_v53 }
  0xc8   :  { %v152_v54 = vpop.permute.xlu1 %151  ;;  %v150_v55 = vpop.permute.xlu0 %149 }
  0xc9   :  { %v326_v18 = vsel %vm322_vm9, %v317_v38, %v152_v54  ;;  %v325_v19 = vsel %vm322_vm9, %v316_v39, %v150_v55 }
  0xca   :  { %v335_v25 = vsel %vm331_vm10, %v326_v18, %v152_v54  ;;  %v334_v26 = vsel %vm331_vm10, %v325_v19, %v150_v55 }
  0xcc   :  { %v156_v56 = vpop.permute.xlu1 %155  ;;  %v154_v57 = vpop.permute.xlu0 %153 }
  0xcd   :  { %v328_v20 = vsel %vm322_vm9, %v319_v44, %v156_v56  ;;  %v327_v12 = vsel %vm322_vm9, %v318_v45, %v154_v57 }
  0xce   :  { %v337_v27 = vsel %vm331_vm10, %v328_v20, %v156_v56  ;;  %v336_v28 = vsel %vm331_vm10, %v327_v12, %v154_v57 }
  0xd0   :  { %v160_v58 = vpop.permute.xlu1 %159  ;;  %v158_v59 = vpop.permute.xlu0 %157 }
  0xd1   :  { %v329_v60 = vsel %vm322_vm9, %v320_v51, %v158_v59  ;;  %v330_v13 = vsel %vm322_vm9, %v321_v50, %v160_v58 }
  0xd2   :  { %v338_v61 = vsel %vm331_vm10, %v329_v60, %v158_v59  ;;  %v339_v29 = vsel %vm331_vm10, %v330_v13, %v160_v58 }
  0xd4   :  { %v172_v62 = vpop.permute.xlu1 %171  ;;  %v170_v63 = vpop.permute.xlu0 %169 }
  0xd5   :  { %v342_v30 = vsel %vm340_vm11, %v333_v23, %v172_v62  ;;  %v341_v31 = vsel %vm340_vm11, %v332_v24, %v170_v63 }
  0xd6   :  { %v351_v39 = vsel %vm349_vm12, %v342_v30, %v172_v62  ;;  %v350_v40 = vsel %vm349_vm12, %v341_v31, %v170_v63 }
  0xd8   :  { %v176_v0 = vpop.permute.xlu1 %175  ;;  %v174_v1 = vpop.permute.xlu0 %173 }
  0xd9   :  { %v344_v32 = vsel %vm340_vm11, %v335_v25, %v176_v0  ;;  %v343_v33 = vsel %vm340_vm11, %v334_v26, %v174_v1 }
  0xda   :  { %v353_v41 = vsel %vm349_vm12, %v344_v32, %v176_v0  ;;  %v352_v42 = vsel %vm349_vm12, %v343_v33, %v174_v1 }
  0xdc   :  { %v180_v2 = vpop.permute.xlu1 %179  ;;  %v178_v3 = vpop.permute.xlu0 %177 }
  0xdd   :  { %v346_v34 = vsel %vm340_vm11, %v337_v27, %v180_v2  ;;  %v345_v35 = vsel %vm340_vm11, %v336_v28, %v178_v3 }
  0xde   :  { %v355_v43 = vsel %vm349_vm12, %v346_v34, %v180_v2  ;;  %v354_v44 = vsel %vm349_vm12, %v345_v35, %v178_v3 }
  0xe0   :  { %v184_v4 = vpop.permute.xlu1 %183  ;;  %v906_v5 = vpop.permute.xlu0 %181 }
  0xe1   :  { %v348_v36 = vsel %vm340_vm11, %v339_v29, %v184_v4  ;;  %v946_v46 = vsel %vm340_vm11, %v338_v61, %v906_v5 }
  0xe2   :  { %v357_v45 = vsel %vm349_vm12, %v348_v36, %v184_v4 }
  0xe4   :  { %v196_v6 = vpop.permute.xlu1 %195  ;;  %v194_v7 = vpop.permute.xlu0 %193 }
  0xe5   :  { %v360_v47 = vsel %vm358_vm13, %v351_v39, %v196_v6  ;;  %v359_v48 = vsel %vm358_vm13, %v350_v40, %v194_v7 }
  0xe8   :  { %v200_v10 = vpop.permute.xlu1 %199  ;;  %v198_v11 = vpop.permute.xlu0 %197 }
  0xe9   :  { %v362_v49 = vsel %vm358_vm13, %v353_v41, %v200_v10  ;;  %v361_v50 = vsel %vm358_vm13, %v352_v42, %v198_v11 }
  0xec   :  { %v204_v21 = vpop.permute.xlu1 %203  ;;  %v202_v22 = vpop.permute.xlu0 %201 }
  0xed   :  { %v953_v51 = vsel %vm358_vm13, %v355_v43, %v204_v21  ;;  %v956_v54 = vsel %vm358_vm13, %v354_v44, %v202_v22 }
  0xf0   :  { %v208_v37 = vpop.permute.xlu1 %207  ;;  %v935_v38 = vpop.permute.xlu0 %205 }
  0xf1   :  { %v959_v55 = vsel %vm358_vm13, %v357_v45, %v208_v37 }
  0xf4   :  { %v220_v52 = vpop.permute.xlu1 %219  ;;  %v218_v53 = vpop.permute.xlu0 %217 }
  0xf5   :  { %v369_v56 = vsel %vm367_vm14, %v360_v47, %v220_v52  ;;  %v368_v57 = vsel %vm367_vm14, %v359_v48, %v218_v53 }
  0xf6   :  { %v385_v58 = vrot.slane %v369_v56, 7  ;;  %v401_v59 = vrot.slane %v369_v56, 6  ;;  %v417_v60 = vrot.slane %v369_v56, 5  ;;  %v433_v61 = vrot.slane %v369_v56, 4 }
  0xf7   :  { %v449_v62 = vrot.slane %v369_v56, 3  ;;  %v465_v63 = vrot.slane %v369_v56, 2  ;;  %v481_v0 = vrot.slane %v369_v56, 1  ;;  %v384_v1 = vrot.slane %v368_v57, 7 }
  0xf8   :  { %v498_v2 = vsel %vm496_vm15, %v369_v56, %v385_v58  ;;  %v400_v3 = vrot.slane %v368_v57, 6  ;;  %v416_v4 = vrot.slane %v368_v57, 5  ;;  %v432_v6 = vrot.slane %v368_v57, 4  ;;  %v224_v23 = vpop.permute.xlu1 %223  ;;  %v222_v24 = vpop.permute.xlu0 %221 }
  0xf9   :  { %v507_v7 = vsel %vm505_vm0, %v498_v2, %v401_v59  ;;  %v560_v8 = vsel %vm505_vm0, %v449_v62, %v465_v63  ;;  %v448_v9 = vrot.slane %v368_v57, 3  ;;  %v464_v10 = vrot.slane %v368_v57, 2 }
  0xfa   :  { %v516_v11 = vsel %vm514_vm1, %v507_v7, %v401_v59  ;;  %v568_v14 = vsel %vm514_vm1, %v560_v8, %v465_v63  ;;  %v480_v15 = vrot.slane %v368_v57, 1  ;;  %v497_v16 = vsel %vm496_vm15, %v368_v57, %v384_v1 }
  0xfb   :  { %v525_v17 = vsel %vm523_vm2, %v516_v11, %v417_v60  ;;  %v576_v18 = vsel %vm523_vm2, %v568_v14, %v481_v0  ;;  %v506_v19 = vsel %vm505_vm0, %v497_v16, %v400_v3  ;;  %v559_v20 = vsel %vm505_vm0, %v448_v9, %v464_v10 }
  0xfc   :  { %v534_v12 = vsel %vm532_vm3, %v525_v17, %v417_v60  ;;  %v584_v13 = vsel %vm532_vm3, %v576_v18, %v481_v0  ;;  %v515_v21 = vsel %vm514_vm1, %v506_v19, %v400_v3  ;;  %v567_v22 = vsel %vm514_vm1, %v559_v20, %v464_v10  ;;  %v228_v7 = vpop.permute.xlu1 %227  ;;  %v226_v8 = vpop.permute.xlu0 %225 }
  0xfd   :  { %v543_v25 = vsel %vm541_vm4, %v534_v12, %v433_v61  ;;  %v592_v26 = vsel %vm541_vm4, %v584_v13, %v369_v56  ;;  %v524_v27 = vsel %vm523_vm2, %v515_v21, %v416_v4  ;;  %v575_v28 = vsel %vm523_vm2, %v567_v22, %v480_v15 }
  0xfe   :  { %v552_v29 = vsel %vm550_vm5, %v543_v25, %v433_v61  ;;  %v600_v30 = vsel %vm550_vm5, %v592_v26, %v385_v58  ;;  %v533_v31 = vsel %vm532_vm3, %v524_v27, %v416_v4  ;;  %v583_v32 = vsel %vm532_vm3, %v575_v28, %v480_v15 }
  0xff   :  { %610 = vst.msk [vmem:[#allocation2 + $0x10] sm:$0xff] %vm607_vm6, %v552_v29  ;;  %611 = vst.msk [vmem:[#allocation2 + $0x18] sm:$0xff] %vm607_vm6, %v600_v30  ;;  %v542_v33 = vsel %vm541_vm4, %v533_v31, %v432_v6  ;;  %v591_v34 = vsel %vm541_vm4, %v583_v32, %v368_v57  ;;  %v371_v35 = vsel %vm367_vm14, %v362_v49, %v224_v23 }
 0x100   :  { %v370_v36 = vsel %vm367_vm14, %v361_v50, %v222_v24  ;;  %v551_v37 = vsel %vm550_vm5, %v542_v33, %v432_v6  ;;  %v599_v39 = vsel %vm550_vm5, %v591_v34, %v384_v1  ;;  %v387_v40 = vrot.slane %v371_v35, 7 }
 0x101   :  { %v403_v41 = vrot.slane %v371_v35, 6  ;;  %608 = vst.msk [vmem:[#allocation2] sm:$0xff] %vm607_vm6, %v551_v37  ;;  %609 = vst.msk [vmem:[#allocation2 + $0x8] sm:$0xff] %vm607_vm6, %v599_v39  ;;  %v419_v42 = vrot.slane %v371_v35, 5  ;;  %v435_v43 = vrot.slane %v371_v35, 4  ;;  %v451_v44 = vrot.slane %v371_v35, 3 }
 0x102   :  { %v467_v45 = vrot.slane %v371_v35, 2  ;;  %v483_v47 = vrot.slane %v371_v35, 1  ;;  %v500_v48 = vsel %vm496_vm15, %v371_v35, %v387_v40  ;;  %v386_v49 = vrot.slane %v370_v36, 7 }
 0x103   :  { %v402_v52 = vrot.slane %v370_v36, 6  ;;  %v509_v50 = vsel %vm505_vm0, %v500_v48, %v403_v41  ;;  %v418_v56 = vrot.slane %v370_v36, 5  ;;  %v434_v57 = vrot.slane %v370_v36, 4 }
 0x104   :  { %v562_v53 = vsel %vm505_vm0, %v451_v44, %v467_v45  ;;  %v518_v58 = vsel %vm514_vm1, %v509_v50, %v403_v41  ;;  %v450_v60 = vrot.slane %v370_v36, 3  ;;  %v466_v61 = vrot.slane %v370_v36, 2 }
 0x105   :  { %v570_v59 = vsel %vm514_vm1, %v562_v53, %v467_v45  ;;  %v527_v62 = vsel %vm523_vm2, %v518_v58, %v419_v42  ;;  %v482_v0 = vrot.slane %v370_v36, 1  ;;  %v499_v1 = vsel %vm496_vm15, %v370_v36, %v386_v49 }
 0x106   :  { %v578_v63 = vsel %vm523_vm2, %v570_v59, %v483_v47  ;;  %v536_v2 = vsel %vm532_vm3, %v527_v62, %v419_v42  ;;  %v508_v4 = vsel %vm505_vm0, %v499_v1, %v402_v52  ;;  %v561_v6 = vsel %vm505_vm0, %v450_v60, %v466_v61 }
 0x107   :  { %v586_v3 = vsel %vm532_vm3, %v578_v63, %v483_v47  ;;  %v545_v9 = vsel %vm541_vm4, %v536_v2, %v435_v43  ;;  %v517_v11 = vsel %vm514_vm1, %v508_v4, %v402_v52  ;;  %v569_v14 = vsel %vm514_vm1, %v561_v6, %v466_v61 }
 0x108   :  { %v594_v10 = vsel %vm541_vm4, %v586_v3, %v371_v35  ;;  %v554_v15 = vsel %vm550_vm5, %v545_v9, %v435_v43  ;;  %v526_v17 = vsel %vm523_vm2, %v517_v11, %v418_v56  ;;  %v577_v18 = vsel %vm523_vm2, %v569_v14, %v482_v0  ;;  %v232_v35 = vpop.permute.xlu1 %231  ;;  %v230_v3 = vpop.permute.xlu0 %229 }
 0x109   :  { %v602_v16 = vsel %vm550_vm5, %v594_v10, %v387_v40  ;;  %614 = vst.msk [vmem:[#allocation2 + $0x30] sm:$0xff] %vm607_vm6, %v554_v15  ;;  %v535_v19 = vsel %vm532_vm3, %v526_v17, %v418_v56  ;;  %v585_v20 = vsel %vm532_vm3, %v577_v18, %v482_v0  ;;  %v373_v12 = vsel %vm367_vm14, %v953_v51, %v228_v7 }
 0x10a   :  { %615 = vst.msk [vmem:[#allocation2 + $0x38] sm:$0xff] %vm607_vm6, %v602_v16  ;;  %v372_v13 = vsel %vm367_vm14, %v956_v54, %v226_v8  ;;  %v544_v21 = vsel %vm541_vm4, %v535_v19, %v434_v57  ;;  %v593_v22 = vsel %vm541_vm4, %v585_v20, %v370_v36  ;;  %v389_v23 = vrot.slane %v373_v12, 7 }
 0x10b   :  { %v405_v24 = vrot.slane %v373_v12, 6  ;;  %v553_v25 = vsel %vm550_vm5, %v544_v21, %v434_v57  ;;  %v601_v26 = vsel %vm550_vm5, %v593_v22, %v386_v49  ;;  %v421_v27 = vrot.slane %v373_v12, 5 }
 0x10c   :  { %v437_v28 = vrot.slane %v373_v12, 4  ;;  %612 = vst.msk [vmem:[#allocation2 + $0x20] sm:$0xff] %vm607_vm6, %v553_v25  ;;  %613 = vst.msk [vmem:[#allocation2 + $0x28] sm:$0xff] %vm607_vm6, %v601_v26  ;;  %v453_v51 = vrot.slane %v373_v12, 3  ;;  %v469_v29 = vrot.slane %v373_v12, 2  ;;  %v485_v30 = vrot.slane %v373_v12, 1 }
 0x10d   :  { %v502_v54 = vsel %vm496_vm15, %v373_v12, %v389_v23  ;;  %v388_v32 = vrot.slane %v372_v13, 7  ;;  %v404_v33 = vrot.slane %v372_v13, 6  ;;  %v420_v34 = vrot.slane %v372_v13, 5 }
 0x10e   :  { %v511_v31 = vsel %vm505_vm0, %v502_v54, %v405_v24  ;;  %v564_v37 = vsel %vm505_vm0, %v453_v51, %v469_v29  ;;  %v436_v39 = vrot.slane %v372_v13, 4  ;;  %v452_v40 = vrot.slane %v372_v13, 3 }
 0x10f   :  { %v520_v36 = vsel %vm514_vm1, %v511_v31, %v405_v24  ;;  %v572_v42 = vsel %vm514_vm1, %v564_v37, %v469_v29  ;;  %v468_v43 = vrot.slane %v372_v13, 2  ;;  %v484_v44 = vrot.slane %v372_v13, 1 }
 0x110   :  { %v529_v41 = vsel %vm523_vm2, %v520_v36, %v421_v27  ;;  %v580_v47 = vsel %vm523_vm2, %v572_v42, %v485_v30  ;;  %v501_v48 = vsel %vm496_vm15, %v372_v13, %v388_v32  ;;  %v375_v49 = vsel %vm367_vm14, %v959_v55, %v232_v35 }
 0x111   :  { %v538_v45 = vsel %vm532_vm3, %v529_v41, %v421_v27  ;;  %v588_v50 = vsel %vm532_vm3, %v580_v47, %v485_v30  ;;  %v510_v53 = vsel %vm505_vm0, %v501_v48, %v404_v33  ;;  %v563_v56 = vsel %vm505_vm0, %v452_v40, %v468_v43 }
 0x112   :  { %v547_v52 = vsel %vm541_vm4, %v538_v45, %v437_v28  ;;  %v596_v58 = vsel %vm541_vm4, %v588_v50, %v373_v12  ;;  %v519_v59 = vsel %vm514_vm1, %v510_v53, %v404_v33  ;;  %v571_v60 = vsel %vm514_vm1, %v563_v56, %v468_v43 }
 0x113   :  { %v556_v57 = vsel %vm550_vm5, %v547_v52, %v437_v28  ;;  %v604_v61 = vsel %vm550_vm5, %v596_v58, %v389_v23  ;;  %v528_v55 = vsel %vm523_vm2, %v519_v59, %v420_v34  ;;  %v579_v62 = vsel %vm523_vm2, %v571_v60, %v484_v44 }
 0x114   :  { %618 = vst.msk [vmem:[#allocation2 + $0x50] sm:$0xff] %vm607_vm6, %v556_v57  ;;  %v391_v63 = vrot.slane %v375_v49, 7  ;;  %619 = vst.msk [vmem:[#allocation2 + $0x58] sm:$0xff] %vm607_vm6, %v604_v61  ;;  %v537_v0 = vsel %vm532_vm3, %v528_v55, %v420_v34  ;;  %v587_v1 = vsel %vm532_vm3, %v579_v62, %v484_v44  ;;  %v407_v2 = vrot.slane %v375_v49, 6 }
 0x115   :  { %v356_v4 = vsel %vm349_vm12, %v946_v46, %v906_v5  ;;  %v546_v6 = vsel %vm541_vm4, %v537_v0, %v436_v39  ;;  %v595_v7 = vsel %vm541_vm4, %v587_v1, %v372_v13  ;;  %v455_v8 = vrot.slane %v375_v49, 3 }
 0x116   :  { %v365_v9 = vsel %vm358_vm13, %v356_v4, %v935_v38  ;;  %v555_v10 = vsel %vm550_vm5, %v546_v6, %v436_v39  ;;  %v603_v11 = vsel %vm550_vm5, %v595_v7, %v388_v32  ;;  %v471_v14 = vrot.slane %v375_v49, 2 }
 0x117   :  { %616 = vst.msk [vmem:[#allocation2 + $0x40] sm:$0xff] %vm607_vm6, %v555_v10  ;;  %617 = vst.msk [vmem:[#allocation2 + $0x48] sm:$0xff] %vm607_vm6, %v603_v11  ;;  %v423_v15 = vrot.slane %v375_v49, 5  ;;  %v487_v16 = vrot.slane %v375_v49, 1  ;;  %v504_v5 = vsel %vm496_vm15, %v375_v49, %v391_v63  ;;  %v374_v46 = vsel %vm367_vm14, %v365_v9, %v230_v3 }
 0x118   :  { %v513_v17 = vsel %vm505_vm0, %v504_v5, %v407_v2  ;;  %v566_v18 = vsel %vm505_vm0, %v455_v8, %v471_v14  ;;  %v390_v38 = vrot.slane %v374_v46, 7  ;;  %v406_v19 = vrot.slane %v374_v46, 6 }
 0x119   :  { %v439_v20 = vrot.slane %v375_v49, 4  ;;  %v522_v12 = vsel %vm514_vm1, %v513_v17, %v407_v2  ;;  %v574_v13 = vsel %vm514_vm1, %v566_v18, %v471_v14  ;;  %v422_v21 = vrot.slane %v374_v46, 5 }
 0x11a   :  { %v531_v22 = vsel %vm523_vm2, %v522_v12, %v423_v15  ;;  %v582_v23 = vsel %vm523_vm2, %v574_v13, %v487_v16  ;;  %v454_v24 = vrot.slane %v374_v46, 3  ;;  %v470_v25 = vrot.slane %v374_v46, 2 }
 0x11b   :  { %v540_v26 = vsel %vm532_vm3, %v531_v22, %v423_v15  ;;  %v590_v27 = vsel %vm532_vm3, %v582_v23, %v487_v16  ;;  %v486_v28 = vrot.slane %v374_v46, 1  ;;  %v503_v51 = vsel %vm496_vm15, %v374_v46, %v390_v38 }
 0x11c   :  { %v549_v29 = vsel %vm541_vm4, %v540_v26, %v439_v20  ;;  %v598_v30 = vsel %vm541_vm4, %v590_v27, %v375_v49  ;;  %v512_v54 = vsel %vm505_vm0, %v503_v51, %v406_v19  ;;  %v565_v31 = vsel %vm505_vm0, %v454_v24, %v470_v25 }
 0x11d   :  { %v558_v32 = vsel %vm550_vm5, %v549_v29, %v439_v20  ;;  %v606_v33 = vsel %vm550_vm5, %v598_v30, %v391_v63  ;;  %v521_v34 = vsel %vm514_vm1, %v512_v54, %v406_v19  ;;  %v573_v35 = vsel %vm514_vm1, %v565_v31, %v470_v25 }
 0x11e   :  { %622 = vst.msk [vmem:[#allocation2 + $0x70] sm:$0xff] %vm607_vm6, %v558_v32  ;;  %623 = vst.msk [vmem:[#allocation2 + $0x78] sm:$0xff] %vm607_vm6, %v606_v33  ;;  %v438_v36 = vrot.slane %v374_v46, 4  ;;  %v530_v37 = vsel %vm523_vm2, %v521_v34, %v422_v21  ;;  %v581_v39 = vsel %vm523_vm2, %v573_v35, %v486_v28 }
 0x11f   :  { %v539_v40 = vsel %vm532_vm3, %v530_v37, %v422_v21  ;;  %v589_v41 = vsel %vm532_vm3, %v581_v39, %v486_v28 }
 0x120   :  { %v548_v42 = vsel %vm541_vm4, %v539_v40, %v438_v36  ;;  %v597_v43 = vsel %vm541_vm4, %v589_v41, %v374_v46 }
 0x121   :  { %v557_v44 = vsel %vm550_vm5, %v548_v42, %v438_v36  ;;  %v605_v45 = vsel %vm550_vm5, %v597_v43, %v390_v38 }
 0x122   :  { %620 = vst.msk [vmem:[#allocation2 + $0x60] sm:$0xff] %vm607_vm6, %v557_v44  ;;  %621 = vst.msk [vmem:[#allocation2 + $0x68] sm:$0xff] %vm607_vm6, %v605_v45 }
 0x123   :  { %662 = shalt.err (!%p659_p4)
}
 0x124   :  { %s663_s6 = scalar_lea.hbm %s1111_s1, 2048 }
 0x125   :  { %p664_p5 = scmp.ne.s32.totalorder %s1111_s1, %s663_s6  ;;  %p667_p6 = scmp.lt.u32.totalorder %s663_s6, %s1111_s1 }
 0x127   :  { %p669_p7 = pnand %p667_p6, %p664_p5 }
 0x129   :  { %672 = shalt.err (!%p669_p7)
}
 0x12a   :  { %s685_s11 = smov 128  }
 0x12b   :  { %635 = dma.vmem_to_hbm [thread:$0]  %s630_s2, 2048, %s1111_s1, [#allocation3], %s685_s11, %s685_s11, %s682_s28  }
 0x12c   :  { %673 = dma.done.wait [#allocation3], 2048  }
 0x12d   :  { %674 = vsyncadd [#allocation3], 4294965248 }
 0x12e   :  { %639 = vsyncpa [#allocation3], 1 }

</bundles_post_ra>
